<compile_context>
chip_gen: v6e
topology: v6e:2x2x1
jax: 0.10.0
libtpu: 0.0.40
codegen_flags: <defaults>
</compile_context>

<pallas_src>
import functools

import jax
import jax.numpy as jnp
from jax.experimental import pallas as pl
from jax.experimental.pallas import tpu as pltpu

_LANE = 128
_SUBLANE = 8
_MAX_BATCH_UNROLL = 64          # bound static unrolling of the per-step batch loop


# --------------------------------------------------------------------------- #
# Small helpers
# --------------------------------------------------------------------------- #
def _round_up(x, m):
    return ((x + m - 1) // m) * m


def _largest_divisor_at_most(n, cap):
    cap = max(1, min(n, cap))
    for d in range(cap, 0, -1):
        if n % d == 0:
            return d
    return 1


def _vmem_capacity_bytes():
    """Per-generation VMEM capacity; conservative (v7x) fallback."""
    try:
        return int(pltpu.get_tpu_info().vmem_capacity_bytes)
    except Exception:
        return 64 << 20


def _is_multi_tensorcore():
    """Best-effort: v7x has 2 TensorCores/chip, v5e/v6e have 1."""
    try:
        kind = jax.devices()[0].device_kind.lower()
        return ("v7" in kind) or ("7x" in kind)
    except Exception:
        return False


_STRIDE0_BCAST = None


def _stride0_broadcast_supported():
    """Runtime probe: does this build support stride-0 sublane-broadcast loads
    (x_ref[pl.ds(k, n, stride=0), :])?  Result is correctness-verified and
    cached; on any failure we fall back to the implicit-broadcast multiply."""
    global _STRIDE0_BCAST
    if _STRIDE0_BCAST is not None:
        return _STRIDE0_BCAST
    try:
        def probe(x_ref, o_ref):
            o_ref[...] = x_ref[pl.ds(1, 8, stride=0), :]

        x = jnp.arange(3 * 128, dtype=jnp.float32).reshape(3, 128)
        out = pl.pallas_call(
            probe, out_shape=jax.ShapeDtypeStruct((8, 128), jnp.float32))(x)
        out = jax.block_until_ready(out)
        _STRIDE0_BCAST = bool(jnp.all(out == x[1:2, :]))
    except Exception:
        _STRIDE0_BCAST = False
    return _STRIDE0_BCAST


# --------------------------------------------------------------------------- #
# Kernel
# --------------------------------------------------------------------------- #
def _adapter_kernel(x_ref, w_ref, b_ref, o_ref, *, bcast_via_load):
    # x_ref: (Bt, Cin, T)   w_ref: (Cout, Cin)   b_ref: (Cout, 1)   o_ref: (Bt, Cout, T)
    bt, cout, _ = o_ref.shape
    cin = x_ref.shape[1]

    # Hoisted loop-invariant broadcasts (bias column + Cin weight columns).
    w = w_ref[...]                                     # (Cout, Cin)
    b_col = b_ref[...]                                 # (Cout, 1)
    w_cols = [w[:, k:k + 1] for k in range(cin)]       # each (Cout, 1)

    for i in range(bt):                                # static unroll over images in block
        if bcast_via_load:
            # Stride-0 sublane-broadcast load: row k replicated across Cout
            # sublanes on the (idle) vld slots instead of VALU/XLU broadcasts.
            xr = [x_ref[i, pl.ds(k, cout, stride=0), :] for k in range(cin)]
        else:
            xi = x_ref[i]                              # (Cin, T)
            xr = [xi[k:k + 1, :] for k in range(cin)]  # (1, T) -> implicit broadcast

        # y[c, p] = bias[c] + sum_k w[c, k] * x[k, p]   (VPU broadcast FMAs)
        acc = b_col + w_cols[0] * xr[0]
        for k in range(1, cin):
            acc = acc + w_cols[k] * xr[k]

        # LeakyReLU(0.2) in max form: mul+max (2 VPU ops/elem) vs cmp+sel+mul.
        o_ref[i] = jnp.maximum(acc, 0.2 * acc).astype(o_ref.dtype)


# --------------------------------------------------------------------------- #
# Block sizing
# --------------------------------------------------------------------------- #
def _choose_blocks(n, cin, cout, hw, itemsize,
                   traffic_target_bytes, vmem_block_budget_bytes):
    """Pick (batch_block Bt, hw_tile).

    Byte-budgeted and Cout-aware: each grid step should move about
    traffic_target_bytes of HBM traffic (input + output), while the
    double-buffered, sublane-padded VMEM footprint of the in/out blocks stays
    within vmem_block_budget_bytes.
    """
    rows_padded = _round_up(cin, _SUBLANE) + _round_up(cout, _SUBLANE)
    bytes_per_px_hbm = (cin + cout) * itemsize          # actual HBM traffic / pixel
    bytes_per_px_vmem = 2 * rows_padded * itemsize      # double-buffered VMEM / pixel

    px_traffic = max(1, traffic_target_bytes // bytes_per_px_hbm)
    px_vmem = max(1, vmem_block_budget_bytes // bytes_per_px_vmem)
    px_budget = min(px_traffic, px_vmem)

    if hw > px_budget:
        # Large image: tile the spatial axis (lane-aligned), one image per step.
        hw_tile = max(_LANE, (px_budget // _LANE) * _LANE)
        bt = 1
    else:
        # Small image(s): take the full spatial extent and pack several images
        # per step so each step still moves a multi-MB block.
        hw_tile = hw
        bt_cap = min(max(1, px_budget // hw), _MAX_BATCH_UNROLL)
        bt = _largest_divisor_at_most(n, bt_cap)        # exact divisor: no partial batch blocks
    return bt, hw_tile


# --------------------------------------------------------------------------- #
# Forward pass
# --------------------------------------------------------------------------- #
def adapter_block_forward(x_nchw, weight, bias, *, traffic_target_bytes=6 << 20):
    """Forward pass of AdapterBlock.

    x_nchw : (N, 3, H, W) float32
    weight : (Cout, 3, 1, 1) float32   (PyTorch Conv2d weight layout)
    bias   : (Cout,) float32
    returns: (N, Cout, H, W) float32
    """
    N, Cin, H, W = x_nchw.shape
    Cout = weight.shape[0]
    HW = H * W
    itemsize = jnp.dtype(x_nchw.dtype).itemsize

    # Free reshapes only -- no transposes, no extra HBM traffic.
    x3 = x_nchw.reshape(N, Cin, HW)          # (N, Cin, HW)
    w_mat = weight.reshape(Cout, Cin)        # (Cout, Cin)
    b_col = bias.reshape(Cout, 1)            # (Cout, 1)

    # Per-generation VMEM budget for the (double-buffered) in/out blocks.
    vmem_cap = _vmem_capacity_bytes()
    vmem_block_budget = min(20 << 20, vmem_cap // 3)

    bt, hw_tile = _choose_blocks(N, Cin, Cout, HW, itemsize,
                                 traffic_target_bytes, vmem_block_budget)
    grid = (pl.cdiv(N, bt), pl.cdiv(HW, hw_tile))

    # Megacore: if the whole problem collapsed to a single grid step on a
    # multi-TC chip (v7x), split the spatial axis so both TensorCores get
    # work.  Gated off on 1-TC chips (v5e/v6e) where it only adds overhead.
    if grid[0] * grid[1] == 1 and hw_tile >= 2 * _LANE and _is_multi_tensorcore():
        hw_tile = _round_up(pl.cdiv(hw_tile, 2), _LANE)
        grid = (pl.cdiv(N, bt), pl.cdiv(HW, hw_tile))

    # Explicit scoped-VMEM limit: covers the chosen blocks with headroom, but
    # never sized toward 128 MiB (v7x only has 64 MiB physical VMEM).
    block_bytes = (2 * bt * hw_tile * itemsize
                   * (_round_up(Cin, _SUBLANE) + _round_up(Cout, _SUBLANE)))
    vmem_limit = int(min(48 << 20, max(32 << 20, block_bytes + (8 << 20))))

    kernel = functools.partial(_adapter_kernel,
                               bcast_via_load=_stride0_broadcast_supported())

    out3 = pl.pallas_call(
        kernel,
        out_shape=jax.ShapeDtypeStruct((N, Cout, HW), x_nchw.dtype),
        grid_spec=pltpu.PrefetchScalarGridSpec(
            num_scalar_prefetch=0,
            grid=grid,
            in_specs=[
                # (Bt images, all 3 channels, lane-aligned spatial tile).
                # NOTE: pipeline_mode=pl.Buffered(3) is a possible follow-up
                # sweep if xprof shows exposed DMA at step boundaries.
                pl.BlockSpec((bt, Cin, hw_tile), lambda n, t: (n, 0, t)),
                # Small weight / bias blocks, resident across all grid steps.
                pl.BlockSpec((Cout, Cin), lambda n, t: (0, 0)),
                pl.BlockSpec((Cout, 1), lambda n, t: (0, 0)),
            ],
            out_specs=pl.BlockSpec((bt, Cout, hw_tile), lambda n, t: (n, 0, t)),
        ),
        compiler_params=pltpu.CompilerParams(
            dimension_semantics=("parallel", "parallel"),
            vmem_limit_bytes=vmem_limit,
        ),
    )(x3, w_mat, b_col)

    return out3.reshape(N, Cout, H, W)


# --------------------------------------------------------------------------- #
# Params / reference / test
# --------------------------------------------------------------------------- #
def init_adapter_params(key, output_channels, in_channels=3):
    """Deterministic init mimicking PyTorch Conv2d default (kaiming-uniform-ish)."""
    kw, kb = jax.random.split(key)
    fan_in = in_channels * 1 * 1
    bound = 1.0 / jnp.sqrt(fan_in)
    weight = jax.random.uniform(
        kw, (output_channels, in_channels, 1, 1),
        minval=-bound, maxval=bound, dtype=jnp.float32)
    bias = jax.random.uniform(
        kb, (output_channels,),
        minval=-bound, maxval=bound, dtype=jnp.float32)
    return weight, bias


def _reference_forward(x_nchw, weight, bias):
    """Pure-JAX reference (1x1 conv == channel matmul) for a correctness check."""
    Cout = weight.shape[0]
    Cin = weight.shape[1]
    w_mat = weight.reshape(Cout, Cin)
    y = jnp.einsum("nchw,oc->nohw", x_nchw, w_mat) + bias.reshape(1, Cout, 1, 1)
    return jnp.where(y >= 0.0, y, 0.2 * y)


if __name__ == "__main__":
    key = jax.random.PRNGKey(0)
    k_x, k_p = jax.random.split(key)

    N, Cin, H, W = 2, 3, 16, 16          # AdapterBlock input always has 3 channels
    output_channels = 8

    x = jax.random.normal(k_x, (N, Cin, H, W), dtype=jnp.float32)
    weight, bias = init_adapter_params(k_p, output_channels, Cin)

    out = adapter_block_forward(x, weight, bias)
    out = jax.block_until_ready(out)

    ref = _reference_forward(x, weight, bias)
    assert out.shape == (N, output_channels, H, W)
    assert jnp.allclose(out, ref, atol=1e-5, rtol=1e-5)

    print("KERNEL_OK")
</pallas_src>

<mosaic_0001>
module attributes {stable_mosaic.version = 11 : i64} {
  func.func @probe(%arg0: memref<3x128xf32, #tpu.memory_space<vmem>>, %arg1: memref<8x128xf32, #tpu.memory_space<vmem>>) attributes {dimension_semantics = [], scalar_prefetch = 0 : i64, scratch_operands = 0 : i64, tpu.core_type = #tpu.core_type<tc>} {
    %c1 = arith.constant 1 : index
    %c0 = arith.constant 0 : index
    %0 = tpu.strided_load %arg0[%c1, %c0] {strides = array<i32: 0, 1>} : memref<3x128xf32, #tpu.memory_space<vmem>>, vector<8x128xf32>
    %c0_0 = arith.constant 0 : index
    %c0_1 = arith.constant 0 : index
    %1 = vector.load %arg1[%c0_0, %c0_1] : memref<8x128xf32, #tpu.memory_space<vmem>>, vector<8x128xf32>
    tpu.vector_store %arg1[%c0_0, %c0_1], %0 {strides = array<i32>} : memref<8x128xf32, #tpu.memory_space<vmem>>, vector<8x128xf32>,
    return
  }
}

module attributes {stable_mosaic.version = 11 : i64} {
  func.func @_adapter_kernel(%arg0: i32, %arg1: i32, %arg2: memref<2x3x256xf32, #tpu.memory_space<vmem>>, %arg3: memref<8x3xf32, #tpu.memory_space<vmem>>, %arg4: memref<8x1xf32, #tpu.memory_space<vmem>>, %arg5: memref<2x8x256xf32, #tpu.memory_space<vmem>>) attributes {dimension_semantics = [#tpu.dimension_semantics<parallel>, #tpu.dimension_semantics<parallel>], iteration_bounds = array<i64: 1, 1>, scalar_prefetch = 0 : i64, scratch_operands = 0 : i64, tpu.core_type = #tpu.core_type<tc>, window_params = [{transform_indices = @transform_0, window_bounds = array<i64: 2, 3, 256>}, {pipeline_mode = #tpu.pipeline_mode<synchronous>, transform_indices = @transform_1, window_bounds = array<i64: 8, 3>}, {pipeline_mode = #tpu.pipeline_mode<synchronous>, transform_indices = @transform_2, window_bounds = array<i64: 8, 1>}, {transform_indices = @transform_3, window_bounds = array<i64: 2, 8, 256>}]} {
    %c0 = arith.constant 0 : index
    %c0_0 = arith.constant 0 : index
    %0 = vector.load %arg3[%c0, %c0_0] : memref<8x3xf32, #tpu.memory_space<vmem>>, vector<8x3xf32>
    %c0_1 = arith.constant 0 : index
    %c0_2 = arith.constant 0 : index
    %1 = vector.load %arg4[%c0_1, %c0_2] : memref<8x1xf32, #tpu.memory_space<vmem>>, vector<8x1xf32>
    %2 = vector.extract_strided_slice %0 {offsets = [0, 0], sizes = [8, 1], strides = [1, 1]} : vector<8x3xf32> to vector<8x1xf32>
    %3 = vector.extract_strided_slice %0 {offsets = [0, 1], sizes = [8, 1], strides = [1, 1]} : vector<8x3xf32> to vector<8x1xf32>
    %4 = vector.extract_strided_slice %0 {offsets = [0, 2], sizes = [8, 1], strides = [1, 1]} : vector<8x3xf32> to vector<8x1xf32>
    %c0_3 = arith.constant 0 : index
    %c0_4 = arith.constant 0 : index
    %c0_5 = arith.constant 0 : index
    %5 = vector.load %arg2[%c0_3, %c0_4, %c0_5] : memref<2x3x256xf32, #tpu.memory_space<vmem>>, vector<1x3x256xf32>
    %6 = vector.shape_cast %5 : vector<1x3x256xf32> to vector<3x256xf32>
    %7 = vector.extract_strided_slice %6 {offsets = [0, 0], sizes = [1, 256], strides = [1, 1]} : vector<3x256xf32> to vector<1x256xf32>
    %8 = vector.extract_strided_slice %6 {offsets = [1, 0], sizes = [1, 256], strides = [1, 1]} : vector<3x256xf32> to vector<1x256xf32>
    %9 = vector.extract_strided_slice %6 {offsets = [2, 0], sizes = [1, 256], strides = [1, 1]} : vector<3x256xf32> to vector<1x256xf32>
    %10 = vector.broadcast %2 : vector<8x1xf32> to vector<8x256xf32>
    %11 = vector.broadcast %7 : vector<1x256xf32> to vector<8x256xf32>
    %12 = arith.mulf %10, %11 : vector<8x256xf32>
    %13 = vector.broadcast %1 : vector<8x1xf32> to vector<8x256xf32>
    %14 = arith.addf %13, %12 : vector<8x256xf32>
    %15 = vector.broadcast %3 : vector<8x1xf32> to vector<8x256xf32>
    %16 = vector.broadcast %8 : vector<1x256xf32> to vector<8x256xf32>
    %17 = arith.mulf %15, %16 : vector<8x256xf32>
    %18 = arith.addf %14, %17 : vector<8x256xf32>
    %19 = vector.broadcast %4 : vector<8x1xf32> to vector<8x256xf32>
    %20 = vector.broadcast %9 : vector<1x256xf32> to vector<8x256xf32>
    %21 = arith.mulf %19, %20 : vector<8x256xf32>
    %22 = arith.addf %18, %21 : vector<8x256xf32>
    %cst = arith.constant 2.000000e-01 : f32
    %23 = vector.broadcast %cst : f32 to vector<8x256xf32>
    %24 = arith.mulf %23, %22 : vector<8x256xf32>
    %25 = arith.maximumf %22, %24 : vector<8x256xf32>
    %c0_6 = arith.constant 0 : index
    %c0_7 = arith.constant 0 : index
    %c0_8 = arith.constant 0 : index
    %26 = vector.load %arg5[%c0_6, %c0_7, %c0_8] : memref<2x8x256xf32, #tpu.memory_space<vmem>>, vector<1x8x256xf32>
    %27 = vector.shape_cast %26 : vector<1x8x256xf32> to vector<8x256xf32>
    %28 = vector.shape_cast %25 : vector<8x256xf32> to vector<1x8x256xf32>
    tpu.vector_store %arg5[%c0_6, %c0_7, %c0_8], %28 {strides = array<i32>} : memref<2x8x256xf32, #tpu.memory_space<vmem>>, vector<1x8x256xf32>,
    %c1 = arith.constant 1 : index
    %c0_9 = arith.constant 0 : index
    %c0_10 = arith.constant 0 : index
    %29 = vector.load %arg2[%c1, %c0_9, %c0_10] : memref<2x3x256xf32, #tpu.memory_space<vmem>>, vector<1x3x256xf32>
    %30 = vector.shape_cast %29 : vector<1x3x256xf32> to vector<3x256xf32>
    %31 = vector.extract_strided_slice %30 {offsets = [0, 0], sizes = [1, 256], strides = [1, 1]} : vector<3x256xf32> to vector<1x256xf32>
    %32 = vector.extract_strided_slice %30 {offsets = [1, 0], sizes = [1, 256], strides = [1, 1]} : vector<3x256xf32> to vector<1x256xf32>
    %33 = vector.extract_strided_slice %30 {offsets = [2, 0], sizes = [1, 256], strides = [1, 1]} : vector<3x256xf32> to vector<1x256xf32>
    %34 = vector.broadcast %2 : vector<8x1xf32> to vector<8x256xf32>
    %35 = vector.broadcast %31 : vector<1x256xf32> to vector<8x256xf32>
    %36 = arith.mulf %34, %35 : vector<8x256xf32>
    %37 = vector.broadcast %1 : vector<8x1xf32> to vector<8x256xf32>
    %38 = arith.addf %37, %36 : vector<8x256xf32>
    %39 = vector.broadcast %3 : vector<8x1xf32> to vector<8x256xf32>
    %40 = vector.broadcast %32 : vector<1x256xf32> to vector<8x256xf32>
    %41 = arith.mulf %39, %40 : vector<8x256xf32>
    %42 = arith.addf %38, %41 : vector<8x256xf32>
    %43 = vector.broadcast %4 : vector<8x1xf32> to vector<8x256xf32>
    %44 = vector.broadcast %33 : vector<1x256xf32> to vector<8x256xf32>
    %45 = arith.mulf %43, %44 : vector<8x256xf32>
    %46 = arith.addf %42, %45 : vector<8x256xf32>
    %cst_11 = arith.constant 2.000000e-01 : f32
    %47 = vector.broadcast %cst_11 : f32 to vector<8x256xf32>
    %48 = arith.mulf %47, %46 : vector<8x256xf32>
    %49 = arith.maximumf %46, %48 : vector<8x256xf32>
    %c1_12 = arith.constant 1 : index
    %c0_13 = arith.constant 0 : index
    %c0_14 = arith.constant 0 : index
    %50 = vector.load %arg5[%c1_12, %c0_13, %c0_14] : memref<2x8x256xf32, #tpu.memory_space<vmem>>, vector<1x8x256xf32>
    %51 = vector.shape_cast %50 : vector<1x8x256xf32> to vector<8x256xf32>
    %52 = vector.shape_cast %49 : vector<8x256xf32> to vector<1x8x256xf32>
    tpu.vector_store %arg5[%c1_12, %c0_13, %c0_14], %52 {strides = array<i32>} : memref<2x8x256xf32, #tpu.memory_space<vmem>>, vector<1x8x256xf32>,
    return
  }
  func.func @transform_0(%arg0: i32, %arg1: i32) -> (i32, i32, i32) {
    %c0_i32 = arith.constant 0 : i32
    %c0_i32_0 = arith.constant 0 : i32
    return %arg0, %c0_i32, %arg1 : i32, i32, i32
  }
  func.func @transform_1(%arg0: i32, %arg1: i32) -> (i32, i32) {
    %c0_i32 = arith.constant 0 : i32
    %c0_i32_0 = arith.constant 0 : i32
    %c0_i32_1 = arith.constant 0 : i32
    return %c0_i32, %c0_i32_0 : i32, i32
  }
  func.func @transform_2(%arg0: i32, %arg1: i32) -> (i32, i32) {
    %c0_i32 = arith.constant 0 : i32
    %c0_i32_0 = arith.constant 0 : i32
    %c0_i32_1 = arith.constant 0 : i32
    return %c0_i32, %c0_i32_0 : i32, i32
  }
  func.func @transform_3(%arg0: i32, %arg1: i32) -> (i32, i32, i32) {
    %c0_i32 = arith.constant 0 : i32
    %c0_i32_0 = arith.constant 0 : i32
    return %arg0, %c0_i32, %arg1 : i32, i32, i32
  }
}

</mosaic_0001>

<bundles_post_ra>
// kernel: tpu_custom_call.1
= control target key start
LH: loop header
LB: loop body
LE: loop exit
PB: predicated region body
PF: predicated region fallthrough
CT: control target
= control target key end

     0   :  { %6 = vsyncpa [#allocation3], 0  ;;  %s102_s0 = inlined_call_operand.hbm [shape: f32[3,128], index: 0, kind: input, shape index: {}]   ;;  %s103_s1 = inlined_call_operand.hbm [shape: f32[8,128], index: 1, kind: output, shape index: {}]  }
   0x1   :  { %7 = vsyncpa [#allocation4], 0  ;;  %s84_s6 = smov [#allocation2]  }
   0x2   :  { %s14_s7 = sshll.u32 %s84_s6, 4  ;;  %s15_s7 = int_to_ptr.vmem [resolvable:$true] %s14_s7 }
   0x3   :  { %s48_s8 = scalar_lea.vmem %s15_s7, 64  ;;  %p53_p1 = scmp.lt.s32.totalorder %s15_s7, %s15_s7 }
   0x4   :  { %p49_p0 = scmp.ne.s32.totalorder %s15_s7, %s48_s8  ;;  %p54_p2 = scmp.lt.s32.totalorder %s48_s8, %s48_s8 }
   0x6   :  { %p55_p3 = por %p54_p2, %p53_p1 }
   0x8   :  { %p56_p4 = pnand %p55_p3, %p49_p0 }
   0xa   :  { %59 = shalt.err (!%p56_p4)
}
   0xb   :  { %17 = dma.hbm_to_vmem [thread:$0]  %s102_s0, 64, %s15_s7, [#allocation3]  }
   0xc   :  { %80 = dma.done.wait [#allocation3], 64  }
   0xd   :  { %81 = vsyncadd [#allocation3], 4294967232  ;;  %s85_s11 = smov [#allocation5]   ;;  %v21_v0 = vld [vmem:[#allocation2 + $0x1] ss:$0 sm:$0xff] }
   0xe   :  { %s29_s12 = sshll.u32 %s85_s11, 4  ;;  %22 = vst [vmem:[#allocation5] sm:$0xff] %v21_v0  ;;  %s30_s12 = int_to_ptr.vmem [resolvable:$true] %s29_s12 }
   0xf   :  { %s60_s13 = scalar_lea.vmem %s30_s12, 128  ;;  %p65_p6 = scmp.lt.s32.totalorder %s30_s12, %s30_s12 }
  0x10   :  { %p61_p5 = scmp.ne.s32.totalorder %s30_s12, %s60_s13  ;;  %p66_p7 = scmp.lt.s32.totalorder %s60_s13, %s60_s13 }
  0x12   :  { %p67_p8 = por %p66_p7, %p65_p6 }
  0x14   :  { %p68_p9 = pnand %p67_p8, %p61_p5 }
  0x16   :  { %71 = shalt.err (!%p68_p9)
}
  0x17   :  { %32 = dma.vmem_to_hbm [thread:$0]  %s30_s12, 128, %s103_s1, [#allocation4]  }
  0x18   :  { %82 = dma.done.wait [#allocation4], 128  }
  0x19   :  { %83 = vsyncadd [#allocation4], 4294967168 }
  0x1a   :  { %36 = vsyncpa [#allocation3], 1 }
  0x1b   :  { %37 = vsyncpa [#allocation4], 1 }

// kernel: tpu_custom_call.1
= control target key start
LH: loop header
LB: loop body
LE: loop exit
PB: predicated region body
PF: predicated region fallthrough
CT: control target
= control target key end

     0   :  { %v234_v1 = vmov 0   ;;  %v235_v2 = vmov 1   ;;  %s275_s0 = inlined_call_operand.vmem [shape: f32[2,3,256], index: 0, kind: input, shape index: {}]   ;;  %s276_s1 = inlined_call_operand.vmem [shape: f32[8,3], index: 1, kind: input, shape index: {}]   ;;  %s277_s2 = inlined_call_operand.vmem [shape: f32[8,1], index: 2, kind: input, shape index: {}]   ;;  %s278_s3 = inlined_call_operand.hbm [shape: f32[2,8,256], index: 3, kind: output, shape index: {}]  }
   0x1   :  { %v15_v0 = vld [vmem:[%s276_s1] sm:$0xff]  ;;  %208 = vset.pattern.permute.xlu0 %v234_v1  ;;  %209 = vset.pattern.permute.xlu1 %v235_v2 }
   0x2   :  { %8 = vsyncpa [#allocation3], 0  ;;  %20 = vperm.xlu0 %208, %v15_v0   ;;  %52 = vperm.xlu1 %209, %v15_v0   ;;  %v16_v3 = vld [vmem:[%s277_s2] sm:$0xff]  ;;  %v236_v4 = vmov 2   ;;  %v24_v5 = vlaneseq  ;;  %v201_v12 = vld [vmem:[%s275_s0 + $0x8] sm:$0x77] }
   0x3   :  { %v17_v9 = vld [vmem:[%s275_s0] sm:$0x77]  ;;  %s237_s0 = smov [#allocation2]  }
   0x4   :  { %v25_v6 = vshrl.u32 %v24_v5, 7  ;;  %s190_s2 = sshll.u32 %s237_s0, 4  ;;  %s191_s2 = int_to_ptr.vmem [resolvable:$true] %s190_s2 }
   0x5   :  { %s212_s19 = scalar_lea.vmem %s191_s2, 512  ;;  %p217_p1 = scmp.lt.s32.totalorder %s191_s2, %s191_s2 }
   0x6   :  { %46 = vperm.xlu0 %208, %v16_v3   ;;  %210 = vset.pattern.permute.xlu1 %v236_v4  ;;  %v26_v7 = vsub.s32 0, %v25_v6  ;;  %v30_v8 = vsub.s32 4, %v25_v6  ;;  %v57_v10 = vsub.s32 1, %v25_v6  ;;  %v61_v11 = vsub.s32 5, %v25_v6  ;;  %p213_p0 = scmp.ne.s32.totalorder %s191_s2, %s212_s19  ;;  %p218_p2 = scmp.lt.s32.totalorder %s212_s19, %s212_s19 }
   0x7   :  { %78 = vperm.xlu1 %210, %v15_v0   ;;  %v83_v13 = vsub.s32 2, %v25_v6  ;;  %v87_v14 = vsub.s32 6, %v25_v6 }
   0x8   :  { %v27_v15 = vrot.slane %v17_v9, %v26_v7  ;;  %v31_v16 = vrot.slane %v17_v9, %v30_v8  ;;  %v115_v17 = vrot.slane %v201_v12, %v26_v7  ;;  %v119_v18 = vrot.slane %v201_v12, %v30_v8  ;;  %p219_p3 = por %p218_p2, %p217_p1 }
   0x9   :  { %v58_v19 = vrot.slane %v17_v9, %v57_v10  ;;  %v62_v20 = vrot.slane %v17_v9, %v61_v11  ;;  %v137_v21 = vrot.slane %v201_v12, %v57_v10  ;;  %v141_v22 = vrot.slane %v201_v12, %v61_v11 }
   0xa   :  { %211 = vset.pattern.permute.xlu0 %v236_v4  ;;  %v84_v23 = vrot.slane %v17_v9, %v83_v13  ;;  %v88_v24 = vrot.slane %v17_v9, %v87_v14  ;;  %v159_v25 = vrot.slane %v201_v12, %v83_v13  ;;  %v163_v26 = vrot.slane %v201_v12, %v87_v14  ;;  %p220_p4 = pnand %p219_p3, %p213_p0 }
   0xb   :  { %v37_v27 = vrot.slane %v27_v15, %v26_v7  ;;  %v41_v28 = vrot.slane %v31_v16, %v26_v7  ;;  %v125_v29 = vrot.slane %v115_v17, %v26_v7  ;;  %v129_v30 = vrot.slane %v119_v18, %v26_v7 }
   0xc   :  { %v68_v32 = vrot.slane %v58_v19, %v57_v10  ;;  %v72_v33 = vrot.slane %v62_v20, %v57_v10  ;;  %v147_v34 = vrot.slane %v137_v21, %v57_v10  ;;  %v151_v35 = vrot.slane %v141_v22, %v57_v10 }
   0xd   :  { %v94_v37 = vrot.slane %v84_v23, %v83_v13  ;;  %v98_v38 = vrot.slane %v88_v24, %v83_v13  ;;  %v169_v39 = vrot.slane %v159_v25, %v83_v13  ;;  %v173_v40 = vrot.slane %v163_v26, %v83_v13 }
  0x7d   :  { %v21_v31 = vpop.permute.xlu0 %20  ;;  %v53_v36 = vpop.permute.xlu1 %52 }
  0x7e   :  { %v42_v41 = vmul.f32 %v37_v27, %v21_v31  ;;  %v43_v42 = vmul.f32 %v41_v28, %v21_v31  ;;  %v130_v43 = vmul.f32 %v125_v29, %v21_v31  ;;  %v131_v44 = vmul.f32 %v129_v30, %v21_v31 }
  0x7f   :  { %v73_v45 = vmul.f32 %v68_v32, %v53_v36  ;;  %v74_v46 = vmul.f32 %v72_v33, %v53_v36  ;;  %v152_v47 = vmul.f32 %v147_v34, %v53_v36  ;;  %v153_v48 = vmul.f32 %v151_v35, %v53_v36 }
  0x81   :  { %v47_v49 = vpop.permute.xlu0 %46 }
  0x82   :  { %v49_v50 = vadd.f32 %v47_v49, %v42_v41  ;;  %v50_v51 = vadd.f32 %v47_v49, %v43_v42  ;;  %v132_v52 = vadd.f32 %v130_v43, %v47_v49  ;;  %v133_v53 = vadd.f32 %v131_v44, %v47_v49  ;;  %v79_v54 = vpop.permute.xlu1 %78 }
  0x83   :  { %v99_v55 = vmul.f32 %v94_v37, %v79_v54  ;;  %v100_v56 = vmul.f32 %v98_v38, %v79_v54  ;;  %v174_v57 = vmul.f32 %v169_v39, %v79_v54  ;;  %v175_v58 = vmul.f32 %v173_v40, %v79_v54 }
  0x84   :  { %v75_v59 = vadd.f32 %v73_v45, %v49_v50  ;;  %v76_v60 = vadd.f32 %v74_v46, %v50_v51  ;;  %v154_v61 = vadd.f32 %v152_v47, %v132_v52  ;;  %v155_v62 = vadd.f32 %v153_v48, %v133_v53 }
  0x86   :  { %v101_v63 = vadd.f32 %v99_v55, %v75_v59  ;;  %v102_v0 = vadd.f32 %v100_v56, %v76_v60  ;;  %v176_v1 = vadd.f32 %v174_v57, %v154_v61  ;;  %v177_v2 = vadd.f32 %v175_v58, %v155_v62 }
  0x88   :  { %v103_v3 = vmul.f32 0.2, %v101_v63  ;;  %v104_v4 = vmul.f32 0.2, %v102_v0  ;;  %v178_v5 = vmul.f32 0.2, %v176_v1 }
  0x89   :  { %v179_v6 = vmul.f32 0.2, %v177_v2 }
  0x8a   :  { %v105_v7 = vmax.f32 %v101_v63, %v103_v3  ;;  %v106_v8 = vmax.f32 %v102_v0, %v104_v4  ;;  %v180_v9 = vmax.f32 %v176_v1, %v178_v5 }
  0x8b   :  { %v181_v10 = vmax.f32 %v177_v2, %v179_v6 }
  0x8c   :  { %107 = vst [vmem:[#allocation2] sm:$0xff] %v105_v7  ;;  %108 = vst [vmem:[#allocation2 + $0x8] sm:$0xff] %v106_v8 }
  0x8d   :  { %183 = vst [vmem:[#allocation2 + $0x10] sm:$0xff] %v180_v9  ;;  %184 = vst [vmem:[#allocation2 + $0x18] sm:$0xff] %v181_v10 }
  0x8e   :  { %223 = shalt.err (!%p220_p4)
}
  0x8f   :  { %s238_s20 = smov 256   ;;  %s239_s21 = smov 16  }
  0x90   :  { %196 = dma.vmem_to_hbm [thread:$0]  %s191_s2, 512, %s278_s3, [#allocation3], %s238_s20, %s238_s20, %s239_s21  }
  0x91   :  { %232 = dma.done.wait [#allocation3], 512  }
  0x92   :  { %233 = vsyncadd [#allocation3], 4294966784 }
  0x93   :  { %200 = vsyncpa [#allocation3], 1 }

</bundles_post_ra>
